<compile_context>
chip_gen: v7x
topology: tpu7x:2x2x1
jax: 0.10.0
libtpu: 0.0.40
codegen_flags: <defaults>
</compile_context>

<pallas_src>
import jax
import jax.numpy as jnp
from jax.experimental import pallas as pl
from jax.experimental.pallas import tpu as pltpu

OUT_PAD = 128   # lane-dense padded width of the final layer (true width = 23)
N_OUT = 23
IN_FEATURES = 1024
HIDDEN = 256


def mlp_kernel(x_ref, w1_ref, b1_ref, w2_ref, b2_ref, w3_ref, b3_ref, o_ref):
    # x tile: (TB, 1024); weights stored as (in, out) in bf16; biases (1, out) f32.
    x = x_ref[...].astype(jnp.bfloat16)
    h1 = jnp.dot(x, w1_ref[...], preferred_element_type=jnp.float32) + b1_ref[...]
    h1 = jnp.maximum(h1, 0.0).astype(jnp.bfloat16)
    h2 = jnp.dot(h1, w2_ref[...], preferred_element_type=jnp.float32) + b2_ref[...]
    h2 = jnp.maximum(h2, 0.0).astype(jnp.bfloat16)
    o = jnp.dot(h2, w3_ref[...], preferred_element_type=jnp.float32) + b3_ref[...]
    o_ref[...] = o.astype(o_ref.dtype)


def _pick_batch_tile(B, tb):
    """Pick the batch tile TB (multiple of 8, sublane granularity)."""
    if B < tb:
        TB = max(8, ((B + 7) // 8) * 8)
    else:
        TB = tb
    # Ensure >= 2 grid steps so the "parallel" batch axis can shard across both
    # v7x TensorCores; on single-TC v5e/v6e a 2-step loop is ~free.
    if B >= 16 and pl.cdiv(B, TB) < 2:
        TB = max(8, ((pl.cdiv(B, 2) + 7) // 8) * 8)
    return TB


def network_forward(x, params, *, tb=1024):
    """x: (B, 1, 32, 32) float32/bfloat16 NCHW -> (B, 23) float32."""
    w1, b1, w2, b2, w3p, b3p = params
    B = x.shape[0]
    x_flat = x.reshape(B, -1)  # (B, 1024), row-major like torch.flatten

    TB = _pick_batch_tile(B, tb)
    grid = (pl.cdiv(B, TB),)   # no wrapper-side padding; last tile is partial

    x_bytes = x_flat.size * x_flat.dtype.itemsize
    w_bytes = sum(a.size * a.dtype.itemsize for a in (w1, b1, w2, b2, w3p, b3p))
    flops = 2 * B * (IN_FEATURES * HIDDEN + HIDDEN * HIDDEN + HIDDEN * OUT_PAD)
    bytes_accessed = x_bytes + w_bytes + B * OUT_PAD * 4

    out_padded = pl.pallas_call(
        mlp_kernel,
        out_shape=jax.ShapeDtypeStruct((B, OUT_PAD), jnp.float32),
        grid=grid,
        in_specs=[
            pl.BlockSpec((TB, IN_FEATURES), lambda i: (i, 0)),     # x tile (pipelined)
            pl.BlockSpec((IN_FEATURES, HIDDEN), lambda i: (0, 0)),  # w1 (resident, bf16)
            pl.BlockSpec((1, HIDDEN), lambda i: (0, 0)),            # b1 (f32)
            pl.BlockSpec((HIDDEN, HIDDEN), lambda i: (0, 0)),       # w2 (resident, bf16)
            pl.BlockSpec((1, HIDDEN), lambda i: (0, 0)),            # b2 (f32)
            pl.BlockSpec((HIDDEN, OUT_PAD), lambda i: (0, 0)),      # w3 (padded, bf16)
            pl.BlockSpec((1, OUT_PAD), lambda i: (0, 0)),           # b3 (padded, f32)
        ],
        out_specs=pl.BlockSpec((TB, OUT_PAD), lambda i: (i, 0)),
        compiler_params=pltpu.CompilerParams(
            dimension_semantics=("parallel",),
            vmem_limit_bytes=32 * 1024 * 1024,
        ),
        cost_estimate=pl.CostEstimate(
            flops=flops, transcendentals=0, bytes_accessed=bytes_accessed
        ),
    )(x_flat, w1, b1, w2, b2, w3p, b3p)

    # Consumers that tolerate the padded (B, 128) buffer can skip this slice.
    return out_padded[:, :N_OUT]


def init_params(key):
    """Deterministic init mimicking PyTorch nn.Linear default (uniform +-1/sqrt(fan_in)).
    Weights stored pre-transposed as (in, out) in bf16 (MXU-native); biases (1, out) f32.
    Layer 3 is zero-padded from 23 -> 128 output columns (lane-dense store)."""
    def linear(key, fan_in, fan_out):
        kw, kb = jax.random.split(key)
        bound = 1.0 / jnp.sqrt(fan_in)
        w = jax.random.uniform(kw, (fan_in, fan_out), jnp.float32, -bound, bound)
        b = jax.random.uniform(kb, (1, fan_out), jnp.float32, -bound, bound)
        return w, b

    k1, k2, k3 = jax.random.split(key, 3)
    w1, b1 = linear(k1, IN_FEATURES, HIDDEN)
    w2, b2 = linear(k2, HIDDEN, HIDDEN)
    w3, b3 = linear(k3, HIDDEN, N_OUT)

    # Pad final layer to OUT_PAD lanes with zeros (extra columns produce zeros
    # that are sliced off in the wrapper).
    w3p = jnp.zeros((HIDDEN, OUT_PAD), jnp.float32).at[:, :N_OUT].set(w3)
    b3p = jnp.zeros((1, OUT_PAD), jnp.float32).at[:, :N_OUT].set(b3)
    return (
        w1.astype(jnp.bfloat16), b1,
        w2.astype(jnp.bfloat16), b2,
        w3p.astype(jnp.bfloat16), b3p,
    )


def reference_forward(x, params):
    """Pure-JAX reference at matching (bf16-input, f32-accumulate) precision."""
    w1, b1, w2, b2, w3p, b3p = params
    h = x.reshape(x.shape[0], -1).astype(jnp.bfloat16)
    h = jnp.maximum(jnp.dot(h, w1, preferred_element_type=jnp.float32) + b1, 0.0)
    h = h.astype(jnp.bfloat16)
    h = jnp.maximum(jnp.dot(h, w2, preferred_element_type=jnp.float32) + b2, 0.0)
    h = h.astype(jnp.bfloat16)
    o = jnp.dot(h, w3p, preferred_element_type=jnp.float32) + b3p
    return o[:, :N_OUT]


if __name__ == "__main__":
    key = jax.random.PRNGKey(0)
    kx, kp = jax.random.split(key)

    # Small batch; spatial must be 32x32 with 1 channel (flatten -> 1024 features).
    x = jax.random.uniform(kx, (2, 1, 32, 32), jnp.float32)
    params = init_params(kp)

    out = network_forward(x, params)
    out = jax.block_until_ready(out)

    ref = reference_forward(x, params)
    assert out.shape == (2, N_OUT), out.shape
    assert jnp.allclose(out, ref, atol=1e-2, rtol=1e-2), "mismatch vs reference"

    # Multi-tile batch with a partial last tile: exercises the no-pad grid path,
    # the >=2-step parallel axis, and masked last-block stores.
    xb = jax.random.uniform(kx, (1040, 1, 32, 32), jnp.float32)
    outb = jax.block_until_ready(network_forward(xb, params))
    refb = reference_forward(xb, params)
    assert outb.shape == (1040, N_OUT), outb.shape
    assert jnp.allclose(outb, refb, atol=1e-2, rtol=1e-2), "mismatch vs reference (batched)"

    # Mid-size batch (single tile at default tb) to exercise the halved-TB
    # 2-step path used for v7x megacore sharding.
    xm = jax.random.uniform(kx, (100, 1, 32, 32), jnp.float32)
    outm = jax.block_until_ready(network_forward(xm, params))
    refm = reference_forward(xm, params)
    assert outm.shape == (100, N_OUT), outm.shape
    assert jnp.allclose(outm, refm, atol=1e-2, rtol=1e-2), "mismatch vs reference (mid)"

    print("KERNEL_OK")
</pallas_src>

<mosaic_0001>
module attributes {stable_mosaic.version = 11 : i64} {
  func.func @mlp_kernel(%arg0: i32, %arg1: memref<8x1024xf32, #tpu.memory_space<vmem>>, %arg2: memref<1024x256xbf16, #tpu.memory_space<vmem>>, %arg3: memref<1x256xf32, #tpu.memory_space<vmem>>, %arg4: memref<256x256xbf16, #tpu.memory_space<vmem>>, %arg5: memref<1x256xf32, #tpu.memory_space<vmem>>, %arg6: memref<256x128xbf16, #tpu.memory_space<vmem>>, %arg7: memref<1x128xf32, #tpu.memory_space<vmem>>, %arg8: memref<8x128xf32, #tpu.memory_space<vmem>>) attributes {dimension_semantics = [#tpu.dimension_semantics<parallel>], iteration_bounds = array<i64: 1>, scalar_prefetch = 0 : i64, scratch_operands = 0 : i64, tpu.core_type = #tpu.core_type<tc>, window_params = [{transform_indices = @transform_0, window_bounds = array<i64: 8, 1024>}, {pipeline_mode = #tpu.pipeline_mode<synchronous>, transform_indices = @transform_1, window_bounds = array<i64: 1024, 256>}, {pipeline_mode = #tpu.pipeline_mode<synchronous>, transform_indices = @transform_2, window_bounds = array<i64: 1, 256>}, {pipeline_mode = #tpu.pipeline_mode<synchronous>, transform_indices = @transform_3, window_bounds = array<i64: 256, 256>}, {pipeline_mode = #tpu.pipeline_mode<synchronous>, transform_indices = @transform_4, window_bounds = array<i64: 1, 256>}, {pipeline_mode = #tpu.pipeline_mode<synchronous>, transform_indices = @transform_5, window_bounds = array<i64: 256, 128>}, {pipeline_mode = #tpu.pipeline_mode<synchronous>, transform_indices = @transform_6, window_bounds = array<i64: 1, 128>}, {transform_indices = @transform_7, window_bounds = array<i64: 8, 128>}]} {
    %c0 = arith.constant 0 : index
    %c0_0 = arith.constant 0 : index
    %0 = vector.load %arg1[%c0, %c0_0] : memref<8x1024xf32, #tpu.memory_space<vmem>>, vector<8x1024xf32>
    %1 = arith.truncf %0 : vector<8x1024xf32> to vector<8x1024xbf16>
    %c0_1 = arith.constant 0 : index
    %c0_2 = arith.constant 0 : index
    %2 = vector.load %arg2[%c0_1, %c0_2] : memref<1024x256xbf16, #tpu.memory_space<vmem>>, vector<1024x256xbf16>
    %cst = arith.constant dense<0.000000e+00> : vector<8x256xf32>
    %3 = tpu.matmul %1, %2, %cst {dimension_numbers = #tpu.dot_dimension_numbers<[1], [0], [0], [1], [0, 0, 1, 1], [], []>} : vector<8x1024xbf16>, vector<1024x256xbf16>, vector<8x256xf32> -> vector<8x256xf32>
    %c0_3 = arith.constant 0 : index
    %c0_4 = arith.constant 0 : index
    %4 = vector.load %arg3[%c0_3, %c0_4] : memref<1x256xf32, #tpu.memory_space<vmem>>, vector<1x256xf32>
    %5 = vector.broadcast %4 : vector<1x256xf32> to vector<8x256xf32>
    %6 = arith.addf %3, %5 : vector<8x256xf32>
    %cst_5 = arith.constant 0.000000e+00 : f32
    %7 = vector.broadcast %cst_5 : f32 to vector<8x256xf32>
    %8 = arith.maximumf %6, %7 : vector<8x256xf32>
    %9 = arith.truncf %8 : vector<8x256xf32> to vector<8x256xbf16>
    %c0_6 = arith.constant 0 : index
    %c0_7 = arith.constant 0 : index
    %10 = vector.load %arg4[%c0_6, %c0_7] : memref<256x256xbf16, #tpu.memory_space<vmem>>, vector<256x256xbf16>
    %cst_8 = arith.constant dense<0.000000e+00> : vector<8x256xf32>
    %11 = tpu.matmul %9, %10, %cst_8 {dimension_numbers = #tpu.dot_dimension_numbers<[1], [0], [0], [1], [0, 0, 1, 1], [], []>} : vector<8x256xbf16>, vector<256x256xbf16>, vector<8x256xf32> -> vector<8x256xf32>
    %c0_9 = arith.constant 0 : index
    %c0_10 = arith.constant 0 : index
    %12 = vector.load %arg5[%c0_9, %c0_10] : memref<1x256xf32, #tpu.memory_space<vmem>>, vector<1x256xf32>
    %13 = vector.broadcast %12 : vector<1x256xf32> to vector<8x256xf32>
    %14 = arith.addf %11, %13 : vector<8x256xf32>
    %cst_11 = arith.constant 0.000000e+00 : f32
    %15 = vector.broadcast %cst_11 : f32 to vector<8x256xf32>
    %16 = arith.maximumf %14, %15 : vector<8x256xf32>
    %17 = arith.truncf %16 : vector<8x256xf32> to vector<8x256xbf16>
    %c0_12 = arith.constant 0 : index
    %c0_13 = arith.constant 0 : index
    %18 = vector.load %arg6[%c0_12, %c0_13] : memref<256x128xbf16, #tpu.memory_space<vmem>>, vector<256x128xbf16>
    %cst_14 = arith.constant dense<0.000000e+00> : vector<8x128xf32>
    %19 = tpu.matmul %17, %18, %cst_14 {dimension_numbers = #tpu.dot_dimension_numbers<[1], [0], [0], [1], [0, 0, 1, 1], [], []>} : vector<8x256xbf16>, vector<256x128xbf16>, vector<8x128xf32> -> vector<8x128xf32>
    %c0_15 = arith.constant 0 : index
    %c0_16 = arith.constant 0 : index
    %20 = vector.load %arg7[%c0_15, %c0_16] : memref<1x128xf32, #tpu.memory_space<vmem>>, vector<1x128xf32>
    %21 = vector.broadcast %20 : vector<1x128xf32> to vector<8x128xf32>
    %22 = arith.addf %19, %21 : vector<8x128xf32>
    %c0_17 = arith.constant 0 : index
    %c0_18 = arith.constant 0 : index
    %23 = vector.load %arg8[%c0_17, %c0_18] : memref<8x128xf32, #tpu.memory_space<vmem>>, vector<8x128xf32>
    tpu.vector_store %arg8[%c0_17, %c0_18], %22 {strides = array<i32>} : memref<8x128xf32, #tpu.memory_space<vmem>>, vector<8x128xf32>,
    return
  }
  func.func @transform_0(%arg0: i32) -> (i32, i32) {
    %c0_i32 = arith.constant 0 : i32
    %c0_i32_0 = arith.constant 0 : i32
    return %arg0, %c0_i32 : i32, i32
  }
  func.func @transform_1(%arg0: i32) -> (i32, i32) {
    %c0_i32 = arith.constant 0 : i32
    %c0_i32_0 = arith.constant 0 : i32
    %c0_i32_1 = arith.constant 0 : i32
    return %c0_i32, %c0_i32_0 : i32, i32
  }
  func.func @transform_2(%arg0: i32) -> (i32, i32) {
    %c0_i32 = arith.constant 0 : i32
    %c0_i32_0 = arith.constant 0 : i32
    %c0_i32_1 = arith.constant 0 : i32
    return %c0_i32, %c0_i32_0 : i32, i32
  }
  func.func @transform_3(%arg0: i32) -> (i32, i32) {
    %c0_i32 = arith.constant 0 : i32
    %c0_i32_0 = arith.constant 0 : i32
    %c0_i32_1 = arith.constant 0 : i32
    return %c0_i32, %c0_i32_0 : i32, i32
  }
  func.func @transform_4(%arg0: i32) -> (i32, i32) {
    %c0_i32 = arith.constant 0 : i32
    %c0_i32_0 = arith.constant 0 : i32
    %c0_i32_1 = arith.constant 0 : i32
    return %c0_i32, %c0_i32_0 : i32, i32
  }
  func.func @transform_5(%arg0: i32) -> (i32, i32) {
    %c0_i32 = arith.constant 0 : i32
    %c0_i32_0 = arith.constant 0 : i32
    %c0_i32_1 = arith.constant 0 : i32
    return %c0_i32, %c0_i32_0 : i32, i32
  }
  func.func @transform_6(%arg0: i32) -> (i32, i32) {
    %c0_i32 = arith.constant 0 : i32
    %c0_i32_0 = arith.constant 0 : i32
    %c0_i32_1 = arith.constant 0 : i32
    return %c0_i32, %c0_i32_0 : i32, i32
  }
  func.func @transform_7(%arg0: i32) -> (i32, i32) {
    %c0_i32 = arith.constant 0 : i32
    %c0_i32_0 = arith.constant 0 : i32
    return %arg0, %c0_i32 : i32, i32
  }
}

</mosaic_0001>

<bundles_post_ra>
// kernel: tpu_custom_call.1
= control target key start
LH: loop header
LB: loop body
LE: loop exit
PB: predicated region body
PF: predicated region fallthrough
CT: control target
= control target key end

     0   :  { %12 = vsyncpa [#allocation3], 0  ;;  %s2357_s0 = inlined_call_operand.hbm [shape: f32[2,1024], index: 0, kind: input, shape index: {}]   ;;  %s2358_s1 = inlined_call_operand.hbm [shape: bf16[1024,256], index: 1, kind: input, shape index: {}]   ;;  %s2359_s2 = inlined_call_operand.vmem [shape: f32[1,256], index: 2, kind: input, shape index: {}]   ;;  %s2360_s3 = inlined_call_operand.hbm [shape: bf16[256,256], index: 3, kind: input, shape index: {}]   ;;  %s2361_s4 = inlined_call_operand.vmem [shape: f32[1,256], index: 4, kind: input, shape index: {}]   ;;  %s2362_s5 = inlined_call_operand.hbm [shape: bf16[256,128], index: 5, kind: input, shape index: {}]   ;;  %s2363_s6 = inlined_call_operand.vmem [shape: f32[1,128], index: 6, kind: input, shape index: {}]   ;;  %s2364_s7 = inlined_call_operand.hbm [shape: f32[2,128], index: 7, kind: output, shape index: {}]  }
   0x1   :  { %13 = vsyncpa [#allocation6], 0 }
   0x2   :  { %14 = vsyncpa [#allocation9], 0 }
   0x3   :  { %15 = vsyncpa [#allocation4], 0 }
   0x4   :  { %20 = vsyncadd [#allocation3], 768  ;;  %s2190_s24 = smov [#allocation5]   ;;  %s2072_s28 = scalar_lea.hbm %s2358_s1, 16384 }
   0x5   :  { %s33_s25 = sshll.u32 %s2190_s24, 4  ;;  %p2073_p0 = scmp.ne.s32.totalorder %s2358_s1, %s2072_s28  ;;  %s34_s25 = int_to_ptr.vmem [resolvable:$true] %s33_s25 }
   0x6   :  { %p2076_p1 = scmp.lt.u32.totalorder %s2072_s28, %s2358_s1 }
   0x8   :  { %p2078_p2 = pnand %p2076_p1, %p2073_p0 }
   0xa   :  { %2081 = shalt.err (!%p2078_p2)
}
   0xb   :  { %s2082_s10 = scalar_lea.vmem %s34_s25, 16384  ;;  %p2087_p4 = scmp.lt.s32.totalorder %s34_s25, %s34_s25 }
   0xc   :  { %p2083_p3 = scmp.ne.s32.totalorder %s34_s25, %s2082_s10  ;;  %p2088_p5 = scmp.lt.s32.totalorder %s2082_s10, %s2082_s10 }
   0xe   :  { %p2089_p6 = por %p2088_p5, %p2087_p4 }
  0x10   :  { %p2090_p7 = pnand %p2089_p6, %p2083_p3 }
  0x12   :  { %2093 = shalt.err (!%p2090_p7)
}
  0x13   :  { %s2191_s11 = smov 128   ;;  %s2192_s12 = smov 8  }
  0x14   :  { %39 = dma.hbm_to_vmem [thread:$0]  %s2358_s1, 16384, %s34_s25, [#allocation6], %s2191_s11, %s2191_s11, %s2192_s12  }
  0x15   :  { %s2193_s15 = smov [#allocation2]   ;;  %s2094_s19 = scalar_lea.hbm %s2357_s0, 256 }
  0x16   :  { %s21_s16 = sshll.u32 %s2193_s15, 4  ;;  %p2095_p8 = scmp.ne.s32.totalorder %s2357_s0, %s2094_s19  ;;  %s22_s16 = int_to_ptr.vmem [resolvable:$true] %s21_s16 }
  0x17   :  { %p2098_p9 = scmp.lt.u32.totalorder %s2094_s19, %s2357_s0 }
  0x19   :  { %p2100_p10 = pnand %p2098_p9, %p2095_p8 }
  0x1b   :  { %2103 = shalt.err (!%p2100_p10)
}
  0x1c   :  { %s2104_s24 = scalar_lea.vmem %s22_s16, 256  ;;  %s2108_s1 = scalar_lea.vmem %s22_s16, 1024 }
  0x1d   :  { %p2105_p11 = scmp.ne.s32.totalorder %s22_s16, %s2104_s24  ;;  %p2109_p12 = scmp.lt.s32.totalorder %s22_s16, %s22_s16 }
  0x1e   :  { %p2110_p13 = scmp.lt.s32.totalorder %s2108_s1, %s2104_s24 }
  0x20   :  { %p2111_p0 = por %p2110_p13, %p2109_p12 }
  0x22   :  { %p2112_p1 = pnand %p2111_p0, %p2105_p11 }
  0x24   :  { %2115 = shalt.err (!%p2112_p1)
}
  0x25   :  { %s2194_s25 = smov 256   ;;  %s2195_s26 = smov 16  }
  0x26   :  { %27 = dma.hbm_to_vmem [thread:$0]  %s2357_s0, 256, %s22_s16, [#allocation3], %s2194_s25, %s2194_s25, %s2195_s26  }
  0x27   :  { %s2196_s29 = smov [#allocation7]   ;;  %s2197_s8 = smov [#allocation8]  }
  0x28   :  { %s47_s30 = sshll.u32 %s2196_s29, 4  ;;  %s61_s9 = sshll.u32 %s2197_s8, 4  ;;  %s48_s30 = int_to_ptr.vmem [resolvable:$true] %s47_s30  ;;  %s2271_s9 = int_to_ptr.vmem [resolvable:$true] %s61_s9 }
  0x29   :  { %s2116_s14 = scalar_lea.hbm %s2360_s3, 4096 }
  0x2a   :  { %p2117_p2 = scmp.ne.s32.totalorder %s2360_s3, %s2116_s14  ;;  %p2120_p3 = scmp.lt.u32.totalorder %s2116_s14, %s2360_s3 }
  0x2c   :  { %p2122_p4 = pnand %p2120_p3, %p2117_p2 }
  0x2e   :  { %2125 = shalt.err (!%p2122_p4)
}
  0x2f   :  { %s2126_s0 = scalar_lea.vmem %s48_s30, 4096  ;;  %p2131_p6 = scmp.lt.s32.totalorder %s48_s30, %s48_s30 }
  0x30   :  { %p2127_p5 = scmp.ne.s32.totalorder %s48_s30, %s2126_s0  ;;  %p2132_p7 = scmp.lt.s32.totalorder %s2126_s0, %s2126_s0 }
  0x32   :  { %p2133_p8 = por %p2132_p7, %p2131_p6 }
  0x34   :  { %p2134_p9 = pnand %p2133_p8, %p2127_p5 }
  0x36   :  { %2137 = shalt.err (!%p2134_p9)
}
  0x37   :  { %53 = dma.hbm_to_vmem [thread:$0]  %s2360_s3, 4096, %s48_s30, [#allocation6], %s2191_s11, %s2191_s11, %s2192_s12  }
  0x38   :  { %s2138_s23 = scalar_lea.hbm %s2362_s5, 2048 }
  0x39   :  { %p2139_p10 = scmp.ne.s32.totalorder %s2362_s5, %s2138_s23  ;;  %p2142_p11 = scmp.lt.u32.totalorder %s2138_s23, %s2362_s5 }
  0x3b   :  { %p2144_p12 = pnand %p2142_p11, %p2139_p10 }
  0x3d   :  { %2147 = shalt.err (!%p2144_p12)
}
  0x3e   :  { %s2148_s27 = scalar_lea.vmem %s2271_s9, 2048  ;;  %p2153_p0 = scmp.lt.s32.totalorder %s2271_s9, %s2271_s9 }
  0x3f   :  { %p2149_p13 = scmp.ne.s32.totalorder %s2271_s9, %s2148_s27  ;;  %p2154_p1 = scmp.lt.s32.totalorder %s2148_s27, %s2148_s27 }
  0x41   :  { %p2155_p2 = por %p2154_p1, %p2153_p0 }
  0x43   :  { %p2156_p3 = pnand %p2155_p2, %p2149_p13 }
  0x45   :  { %2159 = shalt.err (!%p2156_p3)
}
  0x46   :  { %s2198_s3 = smov 64   ;;  %s2199_s11 = smov 4  }
  0x47   :  { %67 = dma.hbm_to_vmem [thread:$0]  %s2362_s5, 2048, %s2271_s9, [#allocation9], %s2198_s3, %s2198_s3, %s2199_s11  }
  0x48   :  { %2182 = dma.done.wait [#allocation3], 1024  }
  0x49   :  { %2183 = vsyncadd [#allocation3], 4294966272 }
  0x4a   :  { %2184 = dma.done.wait [#allocation6], 20480  }
  0x4b   :  { %2185 = vsyncadd [#allocation6], 4294946816 }
  0x4c   :  { %2186 = dma.done.wait [#allocation9], 2048  }
  0x4d   :  { %2187 = vsyncadd [#allocation9], 4294965248  ;;  %v1804_v0 = vld [vmem:[#allocation5 + $0x104] ss:$8 sps:$4 sm:$0xff]   ;;  %v1806_v1 = vld [vmem:[#allocation5 + $0x100] ss:$8 sps:$4 sm:$0xff]   ;;  %v106_v11 = vlaneseq }
  0x4e   :  { %1008 = vmatprep.subr.bf16.mxu0 %v1804_v0  ;;  %v1807_v2 = vld [vmem:[#allocation5 + $0x114] ss:$8 sps:$4 sm:$0xff]   ;;  %v1809_v3 = vld [vmem:[#allocation5 + $0x110] ss:$8 sps:$4 sm:$0xff]   ;;  %v1810_v4 = vld [vmem:[#allocation5 + $0x124] ss:$8 sps:$4 sm:$0xff]  }
  0x4f   :  { %1009 = vmatpush1.bf16.msra.mxu0 %v1806_v1  ;;  %v1812_v5 = vld [vmem:[#allocation5 + $0x120] ss:$8 sps:$4 sm:$0xff]   ;;  %v1813_v6 = vld [vmem:[#allocation5 + $0x134] ss:$8 sps:$4 sm:$0xff]   ;;  %v1815_v7 = vld [vmem:[#allocation5 + $0x130] ss:$8 sps:$4 sm:$0xff]  }
  0x50   :  { %1010 = vmatprep.subr.bf16.mxu0 %v1807_v2  ;;  %v1816_v8 = vld [vmem:[#allocation5 + $0x144] ss:$8 sps:$4 sm:$0xff]   ;;  %v2200_v9 = vmov 1983009808   ;;  %v1818_v12 = vld [vmem:[#allocation5 + $0x140] ss:$8 sps:$4 sm:$0xff]  }
  0x51   :  { %v104_v10 = vunpack.c.l.s4 %v2200_v9  ;;  %v1819_v13 = vld [vmem:[#allocation5 + $0x154] ss:$8 sps:$4 sm:$0xff]   ;;  %v2305_v15 = vshrl.u32 %v106_v11, 7  ;;  %v1821_v16 = vld [vmem:[#allocation5 + $0x150] ss:$8 sps:$4 sm:$0xff]  }
  0x52   :  { %v1822_v17 = vld [vmem:[#allocation5 + $0x164] ss:$8 sps:$4 sm:$0xff]   ;;  %v1824_v19 = vld [vmem:[#allocation5 + $0x160] ss:$8 sps:$4 sm:$0xff]   ;;  %v1825_v22 = vld [vmem:[#allocation5 + $0x174] ss:$8 sps:$4 sm:$0xff]  }
  0x53   :  { %1011 = vmatpush1.bf16.msra.mxu0 %v1809_v3  ;;  %v105_v14 = vunpack.c.0.s8 %v104_v10  ;;  %v1852_v20 = vld [vmem:[#allocation2 + $0x4] ss:$16 sps:$4 sm:$0xff]   ;;  %v1827_v25 = vld [vmem:[#allocation5 + $0x170] ss:$8 sps:$4 sm:$0xff]   ;;  %v1830_v29 = vld [vmem:[#allocation5 + $0x180] ss:$8 sps:$4 sm:$0xff]  }
  0x54   :  { %1012 = vmatprep.subr.bf16.mxu0 %v1810_v4  ;;  %v1854_v21 = vld [vmem:[#allocation2 + $0x24] ss:$16 sps:$4 sm:$0xff]   ;;  %v1833_v31 = vld [vmem:[#allocation5 + $0x190] ss:$8 sps:$4 sm:$0xff]   ;;  %v1836_v33 = vld [vmem:[#allocation5 + $0x1a0] ss:$8 sps:$4 sm:$0xff]  }
  0x55   :  { %v2308_v18 = vsub.s32 %v105_v14, %v2305_v15  ;;  %v1828_v27 = vld [vmem:[#allocation5 + $0x184] ss:$8 sps:$4 sm:$0xff]   ;;  %v1831_v30 = vld [vmem:[#allocation5 + $0x194] ss:$8 sps:$4 sm:$0xff]   ;;  %v1839_v35 = vld [vmem:[#allocation5 + $0x1b0] ss:$8 sps:$4 sm:$0xff]  }
  0x56   :  { %v1834_v32 = vld [vmem:[#allocation5 + $0x1a4] ss:$8 sps:$4 sm:$0xff]   ;;  %v1837_v34 = vld [vmem:[#allocation5 + $0x1b4] ss:$8 sps:$4 sm:$0xff]   ;;  %v1903_v38 = vld [vmem:[#allocation5] ss:$8 sps:$4 sm:$0xff]  }
  0x57   :  { %1013 = vmatpush1.bf16.msra.mxu0 %v1812_v5  ;;  %v116_v23 = vrot.slane %v1852_v20, %v2308_v18  ;;  %v130_v24 = vrot.slane %v1854_v21, %v2308_v18  ;;  %v1840_v36 = vld [vmem:[#allocation5 + $0x1c4] ss:$8 sps:$4 sm:$0xff]   ;;  %v1842_v39 = vld [vmem:[#allocation5 + $0x1c0] ss:$8 sps:$4 sm:$0xff]   ;;  %v1843_v40 = vld [vmem:[#allocation5 + $0x1d4] ss:$8 sps:$4 sm:$0xff]  }
  0x58   :  { %1014 = vmatprep.subr.bf16.mxu0 %v1813_v6  ;;  %v1901_v37 = vld [vmem:[#allocation5 + $0x4] ss:$8 sps:$4 sm:$0xff]   ;;  %v1907_v41 = vld [vmem:[#allocation5 + $0x14] ss:$8 sps:$4 sm:$0xff]   ;;  %v1909_v42 = vld [vmem:[#allocation5 + $0x10] ss:$8 sps:$4 sm:$0xff]  }
  0x59   :  { %v134_v26 = vcombine.high %v116_v23, %v130_v24  ;;  %967 = vmatprep.subr.bf16.mxu1 %v1901_v37  ;;  %v1910_v43 = vld [vmem:[#allocation2 + $0x8] ss:$16 sps:$4 sm:$0xff]   ;;  %v1917_v48 = vld [vmem:[#allocation5 + $0x24] ss:$8 sps:$4 sm:$0xff]   ;;  %v1923_v53 = vld [vmem:[#allocation5 + $0x34] ss:$8 sps:$4 sm:$0xff]   ;;  %v133_v58 = vcombine.low %v116_v23, %v130_v24 }
  0x5a   :  { %968 = vmatpush1.bf16.msra.mxu1 %v1903_v38  ;;  %v1912_v44 = vld [vmem:[#allocation2 + $0x28] ss:$16 sps:$4 sm:$0xff]   ;;  %v145_v46 = vrot.slane %v1910_v43, %v2308_v18  ;;  %v1846_v50 = vld [vmem:[#allocation5 + $0x1e4] ss:$8 sps:$4 sm:$0xff]   ;;  %v1849_v54 = vld [vmem:[#allocation5 + $0x1f4] ss:$8 sps:$4 sm:$0xff]  }
  0x5b   :  { %1015 = vmatpush1.bf16.msra.mxu0 %v1815_v7  ;;  %v182_v28 = vpack.c.bf16 %v134_v26, %v134_v26  ;;  %969 = vmatprep.subr.bf16.mxu1 %v1907_v41  ;;  %v1845_v45 = vld [vmem:[#allocation5 + $0x1d0] ss:$8 sps:$4 sm:$0xff]   ;;  %v159_v47 = vrot.slane %v1912_v44, %v2308_v18  ;;  %v1919_v49 = vld [vmem:[#allocation5 + $0x20] ss:$8 sps:$4 sm:$0xff]   ;;  %v1929_v56 = vld [vmem:[#allocation5 + $0x44] ss:$8 sps:$4 sm:$0xff]   ;;  %v181_v63 = vpack.c.bf16 %v133_v58, %v133_v58 }
  0x5c   :  { %1016 = vmatprep.subr.bf16.mxu0 %v1816_v8  ;;  %v1848_v52 = vld [vmem:[#allocation5 + $0x1e0] ss:$8 sps:$4 sm:$0xff]   ;;  %v1925_v55 = vld [vmem:[#allocation5 + $0x30] ss:$8 sps:$4 sm:$0xff]   ;;  %v1858_v59 = vld [vmem:[#allocation5 + $0x204] ss:$8 sps:$4 sm:$0xff]  }
  0x5d   :  { %1040 = vmatprep.mubr.bf16.mxu0 %v182_v28  ;;  %v2314_v51 = vcombine.low %v145_v46, %v159_v47  ;;  %v1851_v57 = vld [vmem:[#allocation5 + $0x1f0] ss:$8 sps:$4 sm:$0xff]   ;;  %v168_v60 = vcombine.high %v145_v46, %v159_v47  ;;  %v1931_v61 = vld [vmem:[#allocation5 + $0x40] ss:$8 sps:$4 sm:$0xff]   ;;  %v1935_v62 = vld [vmem:[#allocation5 + $0x54] ss:$8 sps:$4 sm:$0xff]  }
  0x5e   :  { %970 = vmatpush1.bf16.msra.mxu1 %v1909_v42  ;;  %v1856_v0 = vld [vmem:[#allocation5 + $0x200] ss:$8 sps:$4 sm:$0xff]   ;;  %v1861_v1 = vld [vmem:[#allocation5 + $0x214] ss:$8 sps:$4 sm:$0xff]   ;;  %v1937_v3 = vld [vmem:[#allocation5 + $0x50] ss:$8 sps:$4 sm:$0xff]  }
  0x5f   :  { %1017 = vmatpush1.bf16.msra.mxu0 %v1818_v12  ;;  %971 = vmatprep.subr.bf16.mxu1 %v1917_v48  ;;  %v184_v2 = vpack.c.bf16 %v168_v60, %v168_v60  ;;  %v1941_v4 = vld [vmem:[#allocation5 + $0x64] ss:$8 sps:$4 sm:$0xff]   ;;  %v1859_v5 = vld [vmem:[#allocation5 + $0x210] ss:$8 sps:$4 sm:$0xff]   ;;  %v1943_v7 = vld [vmem:[#allocation5 + $0x60] ss:$8 sps:$4 sm:$0xff]  }
  0x60   :  { %1018 = vmatprep.subr.bf16.mxu0 %v1819_v13  ;;  %v1864_v6 = vld [vmem:[#allocation5 + $0x224] ss:$8 sps:$4 sm:$0xff]   ;;  %v1947_v8 = vld [vmem:[#allocation5 + $0x74] ss:$8 sps:$4 sm:$0xff]   ;;  %v1862_v9 = vld [vmem:[#allocation5 + $0x220] ss:$8 sps:$4 sm:$0xff]  }
  0x61   :  { %v1867_v10 = vld [vmem:[#allocation5 + $0x234] ss:$8 sps:$4 sm:$0xff]   ;;  %v1949_v11 = vld [vmem:[#allocation5 + $0x70] ss:$8 sps:$4 sm:$0xff]   ;;  %v1953_v12 = vld [vmem:[#allocation5 + $0x84] ss:$8 sps:$4 sm:$0xff]  }
  0x62   :  { %972 = vmatpush1.bf16.msra.mxu1 %v1919_v49  ;;  %v1865_v13 = vld [vmem:[#allocation5 + $0x230] ss:$8 sps:$4 sm:$0xff]   ;;  %v1870_v14 = vld [vmem:[#allocation5 + $0x244] ss:$8 sps:$4 sm:$0xff]   ;;  %v1873_v20 = vld [vmem:[#allocation5 + $0x254] ss:$8 sps:$4 sm:$0xff]  }
  0x63   :  { %1019 = vmatpush1.bf16.msra.mxu0 %v1821_v16  ;;  %973 = vmatprep.subr.bf16.mxu1 %v1923_v53  ;;  %v1955_v16 = vld [vmem:[#allocation5 + $0x80] ss:$8 sps:$4 sm:$0xff]   ;;  %v1961_v21 = vld [vmem:[#allocation5 + $0x90] ss:$8 sps:$4 sm:$0xff]   ;;  %v1876_v24 = vld [vmem:[#allocation5 + $0x264] ss:$8 sps:$4 sm:$0xff]  }
  0x64   :  { %1020 = vmatprep.subr.bf16.mxu0 %v1822_v17  ;;  %v1959_v17 = vld [vmem:[#allocation5 + $0x94] ss:$8 sps:$4 sm:$0xff]   ;;  %v1871_v23 = vld [vmem:[#allocation5 + $0x250] ss:$8 sps:$4 sm:$0xff]   ;;  %v1882_v38 = vld [vmem:[#allocation5 + $0x284] ss:$8 sps:$4 sm:$0xff]  }
  0x65   :  { %v1971_v26 = vld [vmem:[#allocation5 + $0xb4] ss:$8 sps:$4 sm:$0xff]   ;;  %v1877_v37 = vld [vmem:[#allocation5 + $0x270] ss:$8 sps:$4 sm:$0xff]   ;;  %v1989_v49 = vld [vmem:[#allocation5 + $0xe4] ss:$8 sps:$4 sm:$0xff]  }
  0x66   :  { %974 = vmatpush1.bf16.msra.mxu1 %v1925_v55  ;;  %v1879_v28 = vld [vmem:[#allocation5 + $0x274] ss:$8 sps:$4 sm:$0xff]   ;;  %v1985_v48 = vld [vmem:[#allocation5 + $0xd0] ss:$8 sps:$4 sm:$0xff]   ;;  %v2010_v58 = vld [vmem:[#allocation7 + $0x4] ss:$8 sps:$4 sm:$0xff]  }
  0x67   :  { %1021 = vmatpush1.bf16.msra.mxu0 %v1824_v19  ;;  %975 = vmatprep.subr.bf16.mxu1 %v1929_v56  ;;  %v1868_v19 = vld [vmem:[#allocation5 + $0x240] ss:$8 sps:$4 sm:$0xff]   ;;  %v1983_v42 = vld [vmem:[#allocation5 + $0xd4] ss:$8 sps:$4 sm:$0xff]   ;;  %v1894_v60 = vld [vmem:[#allocation5 + $0x2c4] ss:$8 sps:$4 sm:$0xff]  }
  0x68   :  { %1022 = vmatprep.subr.bf16.mxu0 %v1825_v22  ;;  %v1965_v22 = vld [vmem:[#allocation5 + $0xa4] ss:$8 sps:$4 sm:$0xff]   ;;  %v1885_v46 = vld [vmem:[#allocation5 + $0x294] ss:$8 sps:$4 sm:$0xff]  }
  0x69   :  { %v1995_v53 = vld [vmem:[#allocation5 + $0xf4] ss:$8 sps:$4 sm:$0xff]  }
  0x6a   :  { %976 = vmatpush1.bf16.msra.mxu1 %v1931_v61  ;;  %v1891_v55 = vld [vmem:[#allocation5 + $0x2b4] ss:$8 sps:$4 sm:$0xff]  }
  0x6b   :  { %1023 = vmatpush1.bf16.msra.mxu0 %v1827_v25  ;;  %977 = vmatprep.subr.bf16.mxu1 %v1935_v62  ;;  %v1967_v25 = vld [vmem:[#allocation5 + $0xa0] ss:$8 sps:$4 sm:$0xff]  }
  0x6c   :  { %1024 = vmatprep.subr.bf16.mxu0 %v1828_v27  ;;  %v1874_v27 = vld [vmem:[#allocation5 + $0x260] ss:$8 sps:$4 sm:$0xff]  }
  0x6d   :  { %v2008_v62 = vld [vmem:[#allocation7] ss:$8 sps:$4 sm:$0xff]  }
  0x6e   :  { %978 = vmatpush1.bf16.msra.mxu1 %v1937_v3  ;;  %v2016_v3 = vld [vmem:[#allocation7 + $0x24] ss:$8 sps:$4 sm:$0xff]  }
  0x6f   :  { %1025 = vmatpush1.bf16.msra.mxu0 %v1830_v29  ;;  %979 = vmatprep.subr.bf16.mxu1 %v1941_v4  ;;  %v1973_v29 = vld [vmem:[#allocation5 + $0xb0] ss:$8 sps:$4 sm:$0xff]  }
  0x70   :  { %1026 = vmatprep.subr.bf16.mxu0 %v1831_v30  ;;  %v2001_v30 = vld [vmem:[#allocation2] ss:$16 sps:$4 sm:$0xff]  }
  0x71   :  { %v1895_v4 = vld [vmem:[#allocation5 + $0x2d0] ss:$8 sps:$4 sm:$0xff]  }
  0x72   :  { %980 = vmatpush1.bf16.msra.mxu1 %v1943_v7  ;;  %v2019_v7 = vld [vmem:[#allocation7 + $0x34] ss:$8 sps:$4 sm:$0xff]  }
  0x73   :  { %1027 = vmatpush1.bf16.msra.mxu0 %v1833_v31  ;;  %981 = vmatprep.subr.bf16.mxu1 %v1947_v8  ;;  %v2002_v31 = vld [vmem:[#allocation2 + $0x20] ss:$16 sps:$4 sm:$0xff]  }
  0x74   :  { %1028 = vmatprep.subr.bf16.mxu0 %v1834_v32  ;;  %v1977_v32 = vld [vmem:[#allocation5 + $0xc4] ss:$8 sps:$4 sm:$0xff]   ;;  %v1898_v8 = vld [vmem:[#allocation5 + $0x2e0] ss:$8 sps:$4 sm:$0xff]  }
  0x76   :  { %982 = vmatpush1.bf16.msra.mxu1 %v1949_v11  ;;  %v2022_v11 = vld [vmem:[#allocation7 + $0x44] ss:$8 sps:$4 sm:$0xff]  }
  0x77   :  { %1029 = vmatpush1.bf16.msra.mxu0 %v1836_v33  ;;  %983 = vmatprep.subr.bf16.mxu1 %v1953_v12  ;;  %v109_v33 = vrot.slane %v2001_v30, %v2308_v18  ;;  %v1904_v12 = vld [vmem:[#allocation5 + $0x2f0] ss:$8 sps:$4 sm:$0xff]  }
  0x78   :  { %1030 = vmatprep.subr.bf16.mxu0 %v1837_v34  ;;  %v123_v34 = vrot.slane %v2002_v31, %v2308_v18  ;;  %v2029_v30 = vld [vmem:[#allocation7 + $0x70] ss:$8 sps:$4 sm:$0xff]   ;;  %v2034_v31 = vld [vmem:[#allocation7 + $0x84] ss:$8 sps:$4 sm:$0xff]  }
  0x7a   :  { %984 = vmatpush1.bf16.msra.mxu1 %v1955_v16  ;;  %v131_v56 = vcombine.low %v109_v33, %v123_v34  ;;  %v2020_v16 = vld [vmem:[#allocation7 + $0x40] ss:$8 sps:$4 sm:$0xff]  }
  0x7b   :  { %1031 = vmatpush1.bf16.msra.mxu0 %v1839_v35  ;;  %985 = vmatprep.subr.bf16.mxu1 %v1959_v17  ;;  %v2006_v35 = vld [vmem:[#allocation2 + $0xc] ss:$16 sps:$4 sm:$0xff]  }
  0x7c   :  { %1032 = vmatprep.subr.bf16.mxu0 %v1840_v36  ;;  %v2007_v36 = vld [vmem:[#allocation2 + $0x2c] ss:$16 sps:$4 sm:$0xff]   ;;  %v2319_v41 = vrot.slane %v2006_v35, %v2308_v18  ;;  %v179_v61 = vpack.c.bf16 %v131_v56, %v131_v56  ;;  %v1974_v56 = vld [vmem:[#allocation5 + $0x3a0] ss:$8 sps:$4 sm:$0xff]  }
  0x7d   :  { %v2322_v43 = vrot.slane %v2007_v36, %v2308_v18  ;;  %v1991_v18 = vld [vmem:[#allocation5 + $0xe0] ss:$8 sps:$4 sm:$0xff]   ;;  %v2025_v17 = vld [vmem:[#allocation7 + $0x54] ss:$8 sps:$4 sm:$0xff]  }
  0x7e   :  { %986 = vmatpush1.bf16.msra.mxu1 %v1961_v21  ;;  %v2037_v35 = vld [vmem:[#allocation7 + $0x94] ss:$8 sps:$4 sm:$0xff]   ;;  %v1938_v36 = vld [vmem:[#allocation5 + $0x340] ss:$8 sps:$4 sm:$0xff]  }
  0x7f   :  { %1033 = vmatpush1.bf16.msra.mxu0 %v1842_v39  ;;  %987 = vmatprep.subr.bf16.mxu1 %v1965_v22  ;;  %v1979_v39 = vld [vmem:[#allocation5 + $0xc0] ss:$8 sps:$4 sm:$0xff]   ;;  %v2326_v47 = vcombine.low %v2319_v41, %v2322_v43  ;;  %v1922_v22 = vld [vmem:[#allocation5 + $0x314] ss:$8 sps:$4 sm:$0xff]  }
  0x80   :  { %1034 = vmatprep.subr.bf16.mxu0 %v1843_v40  ;;  %v132_v40 = vcombine.high %v109_v33, %v123_v34  ;;  %v1940_v33 = vld [vmem:[#allocation5 + $0x344] ss:$8 sps:$4 sm:$0xff]   ;;  %v2032_v34 = vld [vmem:[#allocation7 + $0x80] ss:$8 sps:$4 sm:$0xff]  }
  0x82   :  { %988 = vmatpush1.bf16.msra.mxu1 %v1967_v25  ;;  %v180_v44 = vpack.c.bf16 %v132_v40, %v132_v40  ;;  %v1920_v25 = vld [vmem:[#allocation5 + $0x310] ss:$8 sps:$4 sm:$0xff]  }
  0x83   :  { %1035 = vmatpush1.bf16.msra.mxu0 %v1845_v45  ;;  %989 = vmatprep.subr.bf16.mxu1 %v1971_v26  ;;  %v1880_v45 = vld [vmem:[#allocation5 + $0x280] ss:$8 sps:$4 sm:$0xff]   ;;  %v1928_v26 = vld [vmem:[#allocation5 + $0x324] ss:$8 sps:$4 sm:$0xff]   ;;  %v1944_v40 = vld [vmem:[#allocation5 + $0x350] ss:$8 sps:$4 sm:$0xff]  }
  0x84   :  { %1036 = vmatprep.subr.bf16.mxu0 %v1846_v50  ;;  %999 = vmatprep.mubr.bf16.mxu1 %v180_v44  ;;  %v1883_v50 = vld [vmem:[#allocation5 + $0x290] ss:$8 sps:$4 sm:$0xff]   ;;  %v1950_v44 = vld [vmem:[#allocation5 + $0x360] ss:$8 sps:$4 sm:$0xff]  }
  0x86   :  { %990 = vmatpush1.bf16.msra.mxu1 %v1973_v29  ;;  %v1934_v29 = vld [vmem:[#allocation5 + $0x334] ss:$8 sps:$4 sm:$0xff]  }
  0x87   :  { %1037 = vmatpush1.bf16.msra.mxu0 %v1848_v52  ;;  %991 = vmatprep.subr.bf16.mxu1 %v1977_v32  ;;  %v1888_v52 = vld [vmem:[#allocation5 + $0x2a4] ss:$8 sps:$4 sm:$0xff]   ;;  %v1932_v32 = vld [vmem:[#allocation5 + $0x330] ss:$8 sps:$4 sm:$0xff]  }
  0x88   :  { %1038 = vmatprep.subr.bf16.mxu0 %v1849_v54  ;;  %v1886_v54 = vld [vmem:[#allocation5 + $0x2a0] ss:$8 sps:$4 sm:$0xff]  }
  0x8a   :  { %992 = vmatpush1.bf16.msra.mxu1 %v1979_v39  ;;  %v2040_v39 = vld [vmem:[#allocation7 + $0xa4] ss:$8 sps:$4 sm:$0xff]  }
  0x8b   :  { %1039 = vmatpush1.bf16.msra.mxu0 %v1851_v57  ;;  %993 = vmatprep.subr.bf16.mxu1 %v1983_v42  ;;  %v1997_v57 = vld [vmem:[#allocation5 + $0xf0] ss:$8 sps:$4 sm:$0xff]   ;;  %v2038_v42 = vld [vmem:[#allocation7 + $0xa0] ss:$8 sps:$4 sm:$0xff]  }
  0x8c   :  { %1049 = vmatprep.subr.bf16.mxu0 %v1858_v59  ;;  %v1889_v59 = vld [vmem:[#allocation5 + $0x2b0] ss:$8 sps:$4 sm:$0xff]  }
  0x8e   :  { %1041 = vmatmul.mubr.bf16.vlgmr.msra.gmra.mrb[0].mxu0 %v181_v63  ;;  %994 = vmatpush1.bf16.msra.mxu1 %v1985_v48  ;;  %v2013_v63 = vld [vmem:[#allocation7 + $0x14] ss:$8 sps:$4 sm:$0xff]   ;;  %v2046_v48 = vld [vmem:[#allocation7 + $0xc4] ss:$8 sps:$4 sm:$0xff]  }
  0x8f   :  { %1050 = vmatpush1.bf16.msra.mxu0 %v1856_v0  ;;  %1081 = vmatprep.mubr.bf16.mxu0 %v184_v2  ;;  %v1892_v0 = vld [vmem:[#allocation5 + $0x2c0] ss:$8 sps:$4 sm:$0xff]   ;;  %v2011_v2 = vld [vmem:[#allocation7 + $0x10] ss:$8 sps:$4 sm:$0xff]  }
  0x90   :  { %1051 = vmatprep.subr.bf16.mxu0 %v1861_v1  ;;  %995 = vmatprep.subr.bf16.mxu1 %v1989_v49  ;;  %v1897_v1 = vld [vmem:[#allocation5 + $0x2d4] ss:$8 sps:$4 sm:$0xff]   ;;  %v1956_v49 = vld [vmem:[#allocation5 + $0x370] ss:$8 sps:$4 sm:$0xff]  }
  0x92   :  { %996 = vmatpush1.bf16.msra.mxu1 %v1991_v18  ;;  %v1962_v18 = vld [vmem:[#allocation5 + $0x380] ss:$8 sps:$4 sm:$0xff]  }
  0x93   :  { %1052 = vmatpush1.bf16.msra.mxu0 %v1859_v5  ;;  %997 = vmatprep.subr.bf16.mxu1 %v1995_v53  ;;  %v1900_v5 = vld [vmem:[#allocation5 + $0x2e4] ss:$8 sps:$4 sm:$0xff]   ;;  %v1970_v53 = vld [vmem:[#allocation5 + $0x394] ss:$8 sps:$4 sm:$0xff]  }
  0x94   :  { %1053 = vmatprep.subr.bf16.mxu0 %v1864_v6  ;;  %v2014_v6 = vld [vmem:[#allocation7 + $0x20] ss:$8 sps:$4 sm:$0xff]  }
  0x96   :  { %998 = vmatpush1.bf16.msra.mxu1 %v1997_v57  ;;  %v1982_v57 = vld [vmem:[#allocation5 + $0x3b4] ss:$8 sps:$4 sm:$0xff]  }
  0x97   :  { %1054 = vmatpush1.bf16.msra.mxu0 %v1862_v9  ;;  %1339 = vmatprep.subr.bf16.mxu1 %v2010_v58  ;;  %v1906_v9 = vld [vmem:[#allocation5 + $0x2f4] ss:$8 sps:$4 sm:$0xff]   ;;  %v1980_v58 = vld [vmem:[#allocation5 + $0x3b0] ss:$8 sps:$4 sm:$0xff]  }
  0x98   :  { %1055 = vmatprep.subr.bf16.mxu0 %v1867_v10  ;;  %v2017_v10 = vld [vmem:[#allocation7 + $0x30] ss:$8 sps:$4 sm:$0xff]  }
  0x99   :  { %1000 = vmatmul.mubr.bf16.vlgmr.msra.gmra.mrb[0].mxu1 %v179_v61  ;;  %v1994_v61 = vld [vmem:[#allocation5 + $0x3d4] ss:$8 sps:$4 sm:$0xff]  }
  0x9a   :  { %1340 = vmatpush1.bf16.msra.mxu1 %v2008_v62  ;;  %v1992_v62 = vld [vmem:[#allocation5 + $0x3d0] ss:$8 sps:$4 sm:$0xff]  }
  0x9b   :  { %1056 = vmatpush1.bf16.msra.mxu0 %v1865_v13  ;;  %1341 = vmatprep.subr.bf16.mxu1 %v2013_v63  ;;  %v170_v13 = vcombine.high %v2319_v41, %v2322_v43  ;;  %v1952_v41 = vld [vmem:[#allocation5 + $0x364] ss:$8 sps:$4 sm:$0xff]   ;;  %v2043_v43 = vld [vmem:[#allocation7 + $0xb4] ss:$8 sps:$4 sm:$0xff]  }
  0x9c   :  { %1057 = vmatprep.subr.bf16.mxu0 %v1870_v14  ;;  %v1916_v14 = vld [vmem:[#allocation5 + $0x304] ss:$8 sps:$4 sm:$0xff]  }
  0x9d   :  { %v186_v21 = vpack.c.bf16 %v170_v13, %v170_v13  ;;  %v2000_v63 = vld [vmem:[#allocation5 + $0x3e4] ss:$8 sps:$4 sm:$0xff]  }
  0x9e   :  { %1342 = vmatpush1.bf16.msra.mxu1 %v2011_v2  ;;  %v2003_v2 = vld [vmem:[#allocation5 + $0x3f0] ss:$8 sps:$4 sm:$0xff]  }
  0x9f   :  { %1058 = vmatpush1.bf16.msra.mxu0 %v1868_v19  ;;  %1343 = vmatprep.subr.bf16.mxu1 %v2016_v3  ;;  %v183_v19 = vpack.c.bf16 %v2314_v51, %v2314_v51  ;;  %v1926_v51 = vld [vmem:[#allocation5 + $0x320] ss:$8 sps:$4 sm:$0xff]   ;;  %v185_v3 = vpack.c.bf16 %v2326_v47, %v2326_v47 }
  0xa0   :  { %1059 = vmatprep.subr.bf16.mxu0 %v1873_v20  ;;  %v1914_v20 = vld [vmem:[#allocation5 + $0x300] ss:$8 sps:$4 sm:$0xff]  }
  0xa2   :  { %1344 = vmatpush1.bf16.msra.mxu1 %v2014_v6  ;;  %v2052_v6 = vld [vmem:[#allocation7 + $0xe4] ss:$8 sps:$4 sm:$0xff]  }
  0xa3   :  { %1060 = vmatpush1.bf16.msra.mxu0 %v1871_v23  ;;  %1345 = vmatprep.subr.bf16.mxu1 %v2019_v7  ;;  %v2023_v23 = vld [vmem:[#allocation7 + $0x50] ss:$8 sps:$4 sm:$0xff]   ;;  %v2050_v7 = vld [vmem:[#allocation7 + $0xe0] ss:$8 sps:$4 sm:$0xff]  }
  0xa4   :  { %1061 = vmatprep.subr.bf16.mxu0 %v1876_v24  ;;  %v2028_v24 = vld [vmem:[#allocation7 + $0x64] ss:$8 sps:$4 sm:$0xff]  }
  0xa6   :  { %1346 = vmatpush1.bf16.msra.mxu1 %v2017_v10  ;;  %v2056_v10 = vld [vmem:[#allocation8 + $0x40] sm:$0xff]  }
  0xa7   :  { %1062 = vmatpush1.bf16.msra.mxu0 %v1874_v27  ;;  %1347 = vmatprep.subr.bf16.mxu1 %v2022_v11  ;;  %v2026_v27 = vld [vmem:[#allocation7 + $0x60] ss:$8 sps:$4 sm:$0xff]  }
  0xa8   :  { %1063 = vmatprep.subr.bf16.mxu0 %v1879_v28  ;;  %v2031_v28 = vld [vmem:[#allocation7 + $0x74] ss:$8 sps:$4 sm:$0xff]  }
  0xaa   :  { %1348 = vmatpush1.bf16.msra.mxu1 %v2020_v16  ;;  %v315_v16 = vld [vmem:[%s2359_s2] sm:$0x3] }
  0xab   :  { %1064 = vmatpush1.bf16.msra.mxu0 %v1877_v37  ;;  %1349 = vmatprep.subr.bf16.mxu1 %v2025_v17  ;;  %v1946_v37 = vld [vmem:[#allocation5 + $0x354] ss:$8 sps:$4 sm:$0xff]   ;;  %v323_v17 = vsub.s32 1, %v2305_v15 }
  0xac   :  { %1065 = vmatprep.subr.bf16.mxu0 %v1882_v38  ;;  %v2035_v38 = vld [vmem:[#allocation7 + $0x90] ss:$8 sps:$4 sm:$0xff]  }
  0xae   :  { %1350 = vmatpush1.bf16.msra.mxu1 %v2023_v23 }
  0xaf   :  { %1066 = vmatpush1.bf16.msra.mxu0 %v1880_v45  ;;  %1351 = vmatprep.subr.bf16.mxu1 %v2028_v24  ;;  %v1958_v45 = vld [vmem:[#allocation5 + $0x374] ss:$8 sps:$4 sm:$0xff]  }
  0xb0   :  { %1067 = vmatprep.subr.bf16.mxu0 %v1885_v46  ;;  %v2041_v46 = vld [vmem:[#allocation7 + $0xb0] ss:$8 sps:$4 sm:$0xff]  }
  0xb2   :  { %1352 = vmatpush1.bf16.msra.mxu1 %v2026_v27 }
  0xb3   :  { %1068 = vmatpush1.bf16.msra.mxu0 %v1883_v50  ;;  %1353 = vmatprep.subr.bf16.mxu1 %v2031_v28  ;;  %v1964_v50 = vld [vmem:[#allocation5 + $0x384] ss:$8 sps:$4 sm:$0xff]  }
  0xb4   :  { %1069 = vmatprep.subr.bf16.mxu0 %v1888_v52  ;;  %v2044_v52 = vld [vmem:[#allocation7 + $0xc0] ss:$8 sps:$4 sm:$0xff]  }
  0xb6   :  { %1354 = vmatpush1.bf16.msra.mxu1 %v2029_v30 }
  0xb7   :  { %1070 = vmatpush1.bf16.msra.mxu0 %v1886_v54  ;;  %1355 = vmatprep.subr.bf16.mxu1 %v2034_v31  ;;  %v1968_v54 = vld [vmem:[#allocation5 + $0x390] ss:$8 sps:$4 sm:$0xff]   ;;  %v2057_v31 = vld [vmem:[#allocation8] sm:$0xff]  }
  0xb8   :  { %1071 = vmatprep.subr.bf16.mxu0 %v1891_v55  ;;  %v1976_v55 = vld [vmem:[#allocation5 + $0x3a4] ss:$8 sps:$4 sm:$0xff]  }
  0xba   :  { %1356 = vmatpush1.bf16.msra.mxu1 %v2032_v34  ;;  %v2060_v34 = vld [vmem:[#allocation8 + $0x50] sm:$0xff]  }
  0xbb   :  { %1072 = vmatpush1.bf16.msra.mxu0 %v1889_v59  ;;  %1357 = vmatprep.subr.bf16.mxu1 %v2037_v35  ;;  %v1988_v59 = vld [vmem:[#allocation5 + $0x3c4] ss:$8 sps:$4 sm:$0xff]   ;;  %v2061_v35 = vld [vmem:[#allocation8 + $0x10] sm:$0xff]  }
  0xbc   :  { %1073 = vmatprep.subr.bf16.mxu0 %v1894_v60  ;;  %v1986_v60 = vld [vmem:[#allocation5 + $0x3c0] ss:$8 sps:$4 sm:$0xff]  }
  0xbe   :  { %1358 = vmatpush1.bf16.msra.mxu1 %v2035_v38  ;;  %v2064_v38 = vld [vmem:[#allocation8 + $0x60] sm:$0xff]  }
  0xbf   :  { %1074 = vmatpush1.bf16.msra.mxu0 %v1892_v0  ;;  %1359 = vmatprep.subr.bf16.mxu1 %v2040_v39  ;;  %v1998_v0 = vld [vmem:[#allocation5 + $0x3e0] ss:$8 sps:$4 sm:$0xff]  }
  0xc0   :  { %1075 = vmatprep.subr.bf16.mxu0 %v1897_v1  ;;  %v2005_v1 = vld [vmem:[#allocation5 + $0x3f4] ss:$8 sps:$4 sm:$0xff]   ;;  %v2065_v39 = vld [vmem:[#allocation8 + $0x20] sm:$0xff]  }
  0xc2   :  { %1360 = vmatpush1.bf16.msra.mxu1 %v2038_v42  ;;  %v2068_v42 = vld [vmem:[#allocation8 + $0x70] sm:$0xff]  }
  0xc3   :  { %1076 = vmatpush1.bf16.msra.mxu0 %v1895_v4  ;;  %1361 = vmatprep.subr.bf16.mxu1 %v2043_v43  ;;  %v2047_v4 = vld [vmem:[#allocation7 + $0xd0] ss:$8 sps:$4 sm:$0xff]  }
  0xc4   :  { %1077 = vmatprep.subr.bf16.mxu0 %v1900_v5  ;;  %v2049_v5 = vld [vmem:[#allocation7 + $0xd4] ss:$8 sps:$4 sm:$0xff]  }
  0xc5   :  { %v2069_v43 = vld [vmem:[#allocation8 + $0x30] sm:$0xff]  }
  0xc6   :  { %1362 = vmatpush1.bf16.msra.mxu1 %v2041_v46  ;;  %v1167_v46 = vld [vmem:[%s2361_s4] sm:$0x3] }
  0xc7   :  { %1078 = vmatpush1.bf16.msra.mxu0 %v1898_v8  ;;  %1363 = vmatprep.subr.bf16.mxu1 %v2046_v48  ;;  %v2055_v8 = vld [vmem:[#allocation7 + $0xf4] ss:$8 sps:$4 sm:$0xff]  }
  0xc8   :  { %1079 = vmatprep.subr.bf16.mxu0 %v1906_v9  ;;  %v2053_v9 = vld [vmem:[#allocation7 + $0xf0] ss:$8 sps:$4 sm:$0xff]  }
  0xca   :  { %1364 = vmatpush1.bf16.msra.mxu1 %v2044_v52 }
  0xcb   :  { %1080 = vmatpush1.bf16.msra.mxu0 %v1904_v12  ;;  %1365 = vmatprep.subr.bf16.mxu1 %v2049_v5 }
  0xcc   :  { %1090 = vmatprep.subr.bf16.mxu0 %v1916_v14  ;;  %v319_v14 = vsub.s32 0, %v2305_v15  ;;  %v2059_v15 = vld [vmem:[#allocation8 + $0x8] sm:$0xff]  }
  0xce   :  { %1082 = vmatmul.mubr.bf16.vlgmr.msra.gmra.mrb[0].mxu0 %v183_v19  ;;  %1366 = vmatpush1.bf16.msra.mxu1 %v2047_v4  ;;  %v320_v19 = vrot.slane %v315_v16, %v319_v14  ;;  %v1172_v48 = vrot.slane %v1167_v46, %v319_v14 }
  0xcf   :  { %1091 = vmatpush1.bf16.msra.mxu0 %v1914_v20  ;;  %1122 = vmatprep.mubr.bf16.mxu0 %v186_v21  ;;  %v324_v20 = vrot.slane %v315_v16, %v323_v17 }
  0xd0   :  { %1092 = vmatprep.subr.bf16.mxu0 %v1922_v22  ;;  %1367 = vmatprep.subr.bf16.mxu1 %v2052_v6 }
  0xd2   :  { %1368 = vmatpush1.bf16.msra.mxu1 %v2050_v7 }
  0xd3   :  { %1093 = vmatpush1.bf16.msra.mxu0 %v1920_v25  ;;  %1369 = vmatprep.subr.bf16.mxu1 %v2055_v8 }
  0xd4   :  { %1094 = vmatprep.subr.bf16.mxu0 %v1928_v26 }
  0xd6   :  { %1370 = vmatpush1.bf16.msra.mxu1 %v2053_v9 }
  0xd7   :  { %1095 = vmatpush1.bf16.msra.mxu0 %v1926_v51  ;;  %1756 = vmatprep.subr.bf16.mxu1 %v2056_v10 }
  0xd8   :  { %1096 = vmatprep.subr.bf16.mxu0 %v1934_v29 }
  0xdb   :  { %1097 = vmatpush1.bf16.msra.mxu0 %v1932_v32 }
  0xdc   :  { %1098 = vmatprep.subr.bf16.mxu0 %v1940_v33  ;;  %v2058_v33 = vld [vmem:[#allocation8 + $0x48] sm:$0xff]  }
  0xdf   :  { %1099 = vmatpush1.bf16.msra.mxu0 %v1938_v36  ;;  %v2062_v36 = vld [vmem:[#allocation8 + $0x58] sm:$0xff]  }
  0xe0   :  { %1100 = vmatprep.subr.bf16.mxu0 %v1946_v37  ;;  %v2063_v37 = vld [vmem:[#allocation8 + $0x18] sm:$0xff]  }
  0xe3   :  { %1101 = vmatpush1.bf16.msra.mxu0 %v1944_v40  ;;  %v2066_v40 = vld [vmem:[#allocation8 + $0x68] sm:$0xff]  }
  0xe4   :  { %1102 = vmatprep.subr.bf16.mxu0 %v1952_v41  ;;  %v2067_v41 = vld [vmem:[#allocation8 + $0x28] sm:$0xff]  }
  0xe7   :  { %1103 = vmatpush1.bf16.msra.mxu0 %v1950_v44  ;;  %v2070_v44 = vld [vmem:[#allocation8 + $0x78] sm:$0xff]  }
  0xe8   :  { %1104 = vmatprep.subr.bf16.mxu0 %v1958_v45  ;;  %v2071_v45 = vld [vmem:[#allocation8 + $0x38] sm:$0xff]  }
  0xeb   :  { %1105 = vmatpush1.bf16.msra.mxu0 %v1956_v49  ;;  %v1176_v49 = vrot.slane %v1167_v46, %v323_v17 }
  0xec   :  { %1106 = vmatprep.subr.bf16.mxu0 %v1964_v50 }
  0xef   :  { %1107 = vmatpush1.bf16.msra.mxu0 %v1962_v18 }
  0xf0   :  { %1108 = vmatprep.subr.bf16.mxu0 %v1970_v53 }
  0xf3   :  { %1109 = vmatpush1.bf16.msra.mxu0 %v1968_v54 }
  0xf4   :  { %1110 = vmatprep.subr.bf16.mxu0 %v1976_v55 }
  0xf7   :  { %1111 = vmatpush1.bf16.msra.mxu0 %v1974_v56 }
  0xf8   :  { %1112 = vmatprep.subr.bf16.mxu0 %v1982_v57 }
  0xfb   :  { %1113 = vmatpush1.bf16.msra.mxu0 %v1980_v58 }
  0xfc   :  { %1114 = vmatprep.subr.bf16.mxu0 %v1988_v59 }
  0xff   :  { %1115 = vmatpush1.bf16.msra.mxu0 %v1986_v60 }
 0x100   :  { %1116 = vmatprep.subr.bf16.mxu0 %v1994_v61  ;;  %v1739_v61 = vld [vmem:[%s2363_s6] ss:$0 sm:$0xff] }
 0x103   :  { %1117 = vmatpush1.bf16.msra.mxu0 %v1992_v62 }
 0x104   :  { %1118 = vmatprep.subr.bf16.mxu0 %v2000_v63 }
 0x107   :  { %1119 = vmatpush1.bf16.msra.mxu0 %v1998_v0 }
 0x108   :  { %1120 = vmatprep.subr.bf16.mxu0 %v2005_v1 }
 0x10b   :  { %1121 = vmatpush1.bf16.msra.mxu0 %v2003_v2 }
 0x10e   :  { %1123 = vmatmul.mubr.bf16.vlgmr.msra.gmra.mrb[0].mxu0 %v185_v3 }
 0x16c   :  { %v1001_v11 = vpop.f32.mrb[0].mxu1 }
 0x16d   :  { %v1003_v12 = vpop.f32.mrb[1].mxu1  ;;  %v1002_v21 = vadd.f32 %v1001_v11, %v320_v19 }
 0x16e   :  { %v1005_v13 = vpop.f32.mrb[2].mxu1  ;;  %v1004_v22 = vadd.f32 %v1003_v12, %v324_v20 }
 0x16f   :  { %v1006_v47 = vpop.f32.mrb[3].mxu1 }
 0x1e1   :  { %v1124_v23 = vpop.f32.mrb[0].mxu0 }
 0x1e2   :  { %v1779_v24 = vadd.f32 %v1124_v23, %v1002_v21  ;;  %v1126_v25 = vpop.f32.mrb[1].mxu0 }
 0x1e3   :  { %v1781_v26 = vadd.f32 %v1126_v25, %v1004_v22  ;;  %v1128_v27 = vpop.f32.mrb[2].mxu0 }
 0x1e4   :  { %v1131_v28 = vmax.f32 %v1779_v24, 0.0  ;;  %v1129_v51 = vpop.f32.mrb[3].mxu0 }
 0x1e5   :  { %v1132_v29 = vmax.f32 %v1781_v26, 0.0 }
 0x1e6   :  { %v1133_v32 = vpack.c.bf16 %v1131_v28, %v1131_v28 }
 0x1e7   :  { %v1134_v30 = vpack.c.bf16 %v1132_v29, %v1132_v29 }
 0x1e9   :  { %1371 = vmatprep.mubr.bf16.mxu1 %v1134_v30 }
 0x1ea   :  { %1372 = vmatmul.mubr.bf16.vlgmr.msra.gmra.mrb[4].mxu1 %v1133_v32 }
 0x1eb   :  { %1757 = vmatpush3.bf16.msra.mxu1 %v2057_v31 }
 0x1ec   :  { %1758 = vmatprep.subr.bf16.mxu1 %v2058_v33 }
 0x1ef   :  { %1759 = vmatpush3.bf16.msra.mxu1 %v2059_v15 }
 0x1f0   :  { %1760 = vmatprep.subr.bf16.mxu1 %v2060_v34 }
 0x1f3   :  { %1761 = vmatpush3.bf16.msra.mxu1 %v2061_v35 }
 0x1f4   :  { %1762 = vmatprep.subr.bf16.mxu1 %v2062_v36 }
 0x1f7   :  { %1763 = vmatpush3.bf16.msra.mxu1 %v2063_v37 }
 0x1f8   :  { %1764 = vmatprep.subr.bf16.mxu1 %v2064_v38 }
 0x1fb   :  { %1765 = vmatpush3.bf16.msra.mxu1 %v2065_v39 }
 0x1fc   :  { %1766 = vmatprep.subr.bf16.mxu1 %v2066_v40 }
 0x1ff   :  { %1767 = vmatpush3.bf16.msra.mxu1 %v2067_v41 }
 0x200   :  { %1768 = vmatprep.subr.bf16.mxu1 %v2068_v42 }
 0x203   :  { %1769 = vmatpush3.bf16.msra.mxu1 %v2069_v43 }
 0x204   :  { %1770 = vmatprep.subr.bf16.mxu1 %v2070_v44 }
 0x207   :  { %1771 = vmatpush3.bf16.msra.mxu1 %v2071_v45 }
 0x2bd   :  { %v1373_v50 = vpop.f32.mrb[4].mxu1 }
 0x2be   :  { %v1374_v52 = vadd.f32 %v1373_v50, %v1172_v48  ;;  %v1375_v18 = vpop.f32.mrb[5].mxu1 }
 0x2bf   :  { %v1376_v53 = vadd.f32 %v1375_v18, %v1176_v49  ;;  %v1377_v54 = vpop.f32.mrb[6].mxu1 }
 0x2c0   :  { %v1380_v55 = vmax.f32 %v1374_v52, 0.0  ;;  %v1378_v56 = vpop.f32.mrb[7].mxu1 }
 0x2c1   :  { %v1381_v57 = vmax.f32 %v1376_v53, 0.0 }
 0x2c2   :  { %v1382_v59 = vpack.c.bf16 %v1380_v55, %v1380_v55 }
 0x2c3   :  { %v1383_v58 = vpack.c.bf16 %v1381_v57, %v1381_v57 }
 0x2c5   :  { %1551 = vmatprep.mubr.bf16.mxu1 %v1383_v58 }
 0x2c6   :  { %1552 = vmatmul.mubr.bf16.vlgmr.msra.gmra.mrb[8].mxu1 %v1382_v59 }
 0x399   :  { %v1772_v60 = vpop.f32.mrb[8].mxu1 }
 0x39a   :  { %v1773_v62 = vpop.f32.mrb[9].mxu1 }
 0x39b   :  { %v1774_v63 = vadd.f32 %v1773_v62, %v1772_v60  ;;  %v1775_v0 = vpop.f32.mrb[10].mxu1 }
 0x39c   :  { %v1776_v1 = vpop.f32.mrb[11].mxu1 }
 0x39d   :  { %v1554_v2 = vadd.f32 %v1774_v63, %v1739_v61 }
 0x39f   :  { %1559 = vst [vmem:[#allocation10] sm:$0xff] %v1554_v2 }
 0x3a0   :  { %1564 = vsyncadd [#allocation4], 96  ;;  %s2201_s4 = smov [#allocation10]  }
 0x3a1   :  { %s1565_s10 = sshll.u32 %s2201_s4, 4  ;;  %s1566_s10 = int_to_ptr.vmem [resolvable:$true] %s1565_s10 }
 0x3a2   :  { %s2160_s13 = scalar_lea.vmem %s1566_s10, 32  ;;  %s2164_s14 = scalar_lea.vmem %s1566_s10, 128 }
 0x3a3   :  { %p2161_p4 = scmp.ne.s32.totalorder %s1566_s10, %s2160_s13  ;;  %p2165_p5 = scmp.lt.s32.totalorder %s1566_s10, %s1566_s10 }
 0x3a4   :  { %p2166_p6 = scmp.lt.s32.totalorder %s2164_s14, %s2160_s13 }
 0x3a6   :  { %p2167_p7 = por %p2166_p6, %p2165_p5 }
 0x3a8   :  { %p2168_p8 = pnand %p2167_p7, %p2161_p4 }
 0x3aa   :  { %2171 = shalt.err (!%p2168_p8)
}
 0x3ab   :  { %s2172_s17 = scalar_lea.hbm %s2364_s7, 32 }
 0x3ac   :  { %p2173_p9 = scmp.ne.s32.totalorder %s2364_s7, %s2172_s17  ;;  %p2176_p10 = scmp.lt.u32.totalorder %s2172_s17, %s2364_s7 }
 0x3ae   :  { %p2178_p11 = pnand %p2176_p10, %p2173_p9 }
 0x3b0   :  { %2181 = shalt.err (!%p2178_p11)
}
 0x3b1   :  { %s2202_s20 = smov 32   ;;  %s2203_s21 = smov 2  }
 0x3b2   :  { %1571 = dma.vmem_to_hbm [thread:$0]  %s1566_s10, 32, %s2364_s7, [#allocation4], %s2202_s20, %s2202_s20, %s2203_s21  }
 0x3b3   :  { %2188 = dma.done.wait [#allocation4], 128  }
 0x3b4   :  { %2189 = vsyncadd [#allocation4], 4294967168 }
 0x3b5   :  { %1575 = vsyncpa [#allocation3], 1 }
 0x3b6   :  { %1576 = vsyncpa [#allocation6], 1 }
 0x3b7   :  { %1577 = vsyncpa [#allocation9], 1 }
 0x3b8   :  { %1578 = vsyncpa [#allocation4], 1 }

</bundles_post_ra>
